<compile_context>
chip_gen: v7x
topology: tpu7x:2x2x1
jax: 0.10.0
libtpu: 0.0.40
codegen_flags: <defaults>
</compile_context>

<pallas_src>
import jax
import jax.numpy as jnp
from jax.experimental import pallas as pl
from jax.experimental.pallas import tpu as pltpu


def _vmem_capacity_bytes():
    try:
        return int(pltpu.get_tpu_info().vmem_capacity_bytes)
    except Exception:
        return 64 * 1024 * 1024  # conservative (v7x per-TC VMEM)


def _ds(start, size, step):
    return pl.ds(start, size) if step == 1 else pl.ds(start, size, step)


def make_udm_kernel(BB, T, T_pad, T_conv, T_out, C, K, stride, padding, factor,
                    eps):
    """UDM forward for a block of BB batch elements.

    Refs:
      x_ref    : (BB, T, C)      unpadded input block
      w_ref    : (K, C)          depthwise conv weights (w[k, c] == torch_w[c, 0, k])
      b_ref    : (1, C)          conv bias
      g_ref    : (1, C)          LayerNorm gamma
      beta_ref : (1, C)          LayerNorm beta
      o_ref    : (BB, T_out, C)  output block
      xpad_ref : (BB, T_pad, C)  VMEM scratch: zero-padded input strip
      act_ref  : (BB, T_conv, C) VMEM scratch: post-ReLU activations
    """

    def kernel(x_ref, w_ref, b_ref, g_ref, beta_ref, o_ref, xpad_ref, act_ref):
        # ---- zero-padded input strip in VMEM -----------------------------------
        # Edges are re-zeroed every step (cheap: `padding` rows per edge).  This is
        # safe even when the grid axis is sharded across TensorCores, unlike
        # zeroing only on program_id(0) == 0 (scratch is per-core).
        if padding > 0:
            zero_edge = jnp.zeros((BB, padding, C), jnp.float32)
            xpad_ref[:, :padding, :] = zero_edge
            xpad_ref[:, padding + T:, :] = zero_edge
            xpad_ref[:, padding:padding + T, :] = x_ref[...].astype(jnp.float32)
            src = xpad_ref
        else:
            src = x_ref  # no halo needed; read taps straight from the input block

        # ---- depthwise Conv1d: K strided whole-block MACs over time ------------
        w = w_ref[...].astype(jnp.float32)          # (K, C), loaded once
        bias = b_ref[...].astype(jnp.float32)       # (1, C)
        acc = jnp.broadcast_to(bias, (BB, T_conv, C))
        for k in range(K):
            xk = src[:, _ds(k, T_conv, stride), :].astype(jnp.float32)
            acc = acc + xk * w[k:k + 1, :]

        # ---- LayerNorm over channels (lane axis) + ReLU -------------------------
        mean = jnp.mean(acc, axis=-1, keepdims=True)
        cen = acc - mean
        var = jnp.mean(cen * cen, axis=-1, keepdims=True)
        normed = cen * jax.lax.rsqrt(var + eps)
        normed = (normed * g_ref[...].astype(jnp.float32)
                  + beta_ref[...].astype(jnp.float32))
        act_ref[...] = jnp.maximum(normed, 0.0)

        # ---- MaxPool1d(factor): `factor` strided whole-block maxes over time ----
        res = act_ref[:, _ds(0, T_out, factor), :]
        for f in range(1, factor):
            res = jnp.maximum(res, act_ref[:, _ds(f, T_out, factor), :])
        o_ref[...] = res.astype(o_ref.dtype)

    return kernel


def udm_forward(x, w, b, gamma, beta, *, kernel_size, stride, padding, factor,
                eps=1e-5, block_b=None):
    """x: (B, T, C) float32/bfloat16. Returns (B, T_out, C)."""
    B, T, C = x.shape
    K = kernel_size
    T_pad = T + 2 * padding
    T_conv = (T_pad - K) // stride + 1
    T_out = T_conv // factor
    assert T_conv >= 1 and T_out >= 1

    vmem_cap = _vmem_capacity_bytes()
    if block_b is None:
        itemsize = 4
        # double-buffered in/out blocks + the two scratch strips + intermediate headroom
        per_b = itemsize * (2 * T * C + 2 * T_out * C + T_pad * C
                            + T_conv * C + 4 * T_conv * C)
        budget = vmem_cap // 2
        block_b = max(1, min(B, budget // max(per_b, 1)))
        if B >= 4:
            # keep at least 2 grid steps so dual-TensorCore chips get parallel work
            block_b = min(block_b, -(-B // 2))
    BB = block_b
    nb = -(-B // BB)           # ceil(B / BB)
    B_full = nb * BB
    if B_full != B:            # pad batch to a multiple of the block (sliced off below)
        x = jnp.pad(x, ((0, B_full - B), (0, 0), (0, 0)))

    w2 = w.reshape(K, C)
    b2 = b.reshape(1, C)
    g2 = gamma.reshape(1, C)
    be2 = beta.reshape(1, C)

    kernel = make_udm_kernel(BB, T, T_pad, T_conv, T_out, C, K, stride, padding,
                             factor, eps)

    # TODO(synk): for C < 128, fold batch groups into the lane axis (lane-dense
    # stores + block-diagonal-matmul LayerNorm reduce); needs a wrapper transpose,
    # only pays off when the kernel is VALU/store-bound rather than HBM-bound.
    out = pl.pallas_call(
        kernel,
        out_shape=jax.ShapeDtypeStruct((B_full, T_out, C), x.dtype),
        grid_spec=pltpu.PrefetchScalarGridSpec(
            num_scalar_prefetch=0,
            grid=(nb,),
            in_specs=[
                pl.BlockSpec((BB, T, C), lambda bi: (bi, 0, 0)),
                pl.BlockSpec((K, C), lambda bi: (0, 0)),
                pl.BlockSpec((1, C), lambda bi: (0, 0)),
                pl.BlockSpec((1, C), lambda bi: (0, 0)),
                pl.BlockSpec((1, C), lambda bi: (0, 0)),
            ],
            out_specs=pl.BlockSpec((BB, T_out, C), lambda bi: (bi, 0, 0)),
            scratch_shapes=[
                pltpu.VMEM((BB, T_pad, C), jnp.float32),
                pltpu.VMEM((BB, T_conv, C), jnp.float32),
            ],
        ),
        compiler_params=pltpu.CompilerParams(
            dimension_semantics=("parallel",),
            vmem_limit_bytes=max(32 * 1024 * 1024, (vmem_cap * 3) // 4),
        ),
    )(x, w2, b2, g2, be2)
    return out[:B]


def udm_reference(x, w, b, gamma, beta, *, kernel_size, stride, padding, factor,
                  eps=1e-5):
    """Pure-JAX reference mirroring the PyTorch forward."""
    B, T, C = x.shape
    K = kernel_size
    rhs = w.reshape(K, 1, C)  # WIO, feature_group_count = C (depthwise)
    conv = jax.lax.conv_general_dilated(
        x, rhs, window_strides=(stride,), padding=[(padding, padding)],
        dimension_numbers=("NWC", "WIO", "NWC"), feature_group_count=C) + b
    mean = jnp.mean(conv, axis=-1, keepdims=True)
    var = jnp.mean(jnp.square(conv - mean), axis=-1, keepdims=True)
    normed = (conv - mean) * jax.lax.rsqrt(var + eps) * gamma + beta
    act = jnp.maximum(normed, 0.0)
    T_conv = act.shape[1]
    T_out = T_conv // factor
    act = act[:, :T_out * factor, :].reshape(B, T_out, factor, C)
    return jnp.max(act, axis=2)


if __name__ == "__main__":
    # Module hyper-params (in_channels == out_channels so LayerNorm is valid)
    in_channels = 32
    out_channels = 32
    kernel_size = 3
    stride = 2
    padding = 1
    factor = 2

    B, T, C = 2, 16, in_channels

    key = jax.random.PRNGKey(0)
    kx, kw, kb, kg, kbe = jax.random.split(key, 5)
    x = jax.random.normal(kx, (B, T, C), dtype=jnp.float32)
    # torch Conv1d depthwise weight is (C, 1, K); stored here as (K, C).
    w = jax.random.normal(kw, (kernel_size, C), dtype=jnp.float32) * 0.3
    b = jax.random.normal(kb, (C,), dtype=jnp.float32) * 0.1
    gamma = 1.0 + 0.05 * jax.random.normal(kg, (C,), dtype=jnp.float32)
    beta = 0.05 * jax.random.normal(kbe, (C,), dtype=jnp.float32)

    out = udm_forward(x, w, b, gamma, beta,
                      kernel_size=kernel_size, stride=stride,
                      padding=padding, factor=factor)
    out = jax.block_until_ready(out)

    ref = udm_reference(x, w, b, gamma, beta,
                        kernel_size=kernel_size, stride=stride,
                        padding=padding, factor=factor)
    assert out.shape == ref.shape, (out.shape, ref.shape)
    assert jnp.allclose(out, ref, atol=1e-4, rtol=1e-4), \
        float(jnp.max(jnp.abs(out - ref)))

    print("KERNEL_OK")
</pallas_src>

<mosaic_0001>
module attributes {stable_mosaic.version = 11 : i64} {
  func.func @kernel(%arg0: i32, %arg1: memref<2x16x32xf32, #tpu.memory_space<vmem>>, %arg2: memref<3x32xf32, #tpu.memory_space<vmem>>, %arg3: memref<1x32xf32, #tpu.memory_space<vmem>>, %arg4: memref<1x32xf32, #tpu.memory_space<vmem>>, %arg5: memref<1x32xf32, #tpu.memory_space<vmem>>, %arg6: memref<2x4x32xf32, #tpu.memory_space<vmem>>, %arg7: memref<2x18x32xf32, #tpu.memory_space<vmem>>, %arg8: memref<2x8x32xf32, #tpu.memory_space<vmem>>) attributes {dimension_semantics = [#tpu.dimension_semantics<parallel>], iteration_bounds = array<i64: 1>, scalar_prefetch = 0 : i64, scratch_operands = 2 : i64, tpu.core_type = #tpu.core_type<tc>, window_params = [{transform_indices = @transform_0, window_bounds = array<i64: 2, 16, 32>}, {pipeline_mode = #tpu.pipeline_mode<synchronous>, transform_indices = @transform_1, window_bounds = array<i64: 3, 32>}, {pipeline_mode = #tpu.pipeline_mode<synchronous>, transform_indices = @transform_2, window_bounds = array<i64: 1, 32>}, {pipeline_mode = #tpu.pipeline_mode<synchronous>, transform_indices = @transform_3, window_bounds = array<i64: 1, 32>}, {pipeline_mode = #tpu.pipeline_mode<synchronous>, transform_indices = @transform_4, window_bounds = array<i64: 1, 32>}, {transform_indices = @transform_5, window_bounds = array<i64: 2, 4, 32>}]} {
    %cst = arith.constant 0.000000e+00 : f32
    %0 = vector.broadcast %cst : f32 to vector<2x1x32xf32>
    %c0 = arith.constant 0 : index
    %c0_0 = arith.constant 0 : index
    %c0_1 = arith.constant 0 : index
    %1 = vector.load %arg7[%c0, %c0_0, %c0_1] : memref<2x18x32xf32, #tpu.memory_space<vmem>>, vector<2x1x32xf32>
    tpu.vector_store %arg7[%c0, %c0_0, %c0_1], %0 {strides = array<i32>} : memref<2x18x32xf32, #tpu.memory_space<vmem>>, vector<2x1x32xf32>,
    %c0_2 = arith.constant 0 : index
    %c17 = arith.constant 17 : index
    %c0_3 = arith.constant 0 : index
    %2 = vector.load %arg7[%c0_2, %c17, %c0_3] : memref<2x18x32xf32, #tpu.memory_space<vmem>>, vector<2x1x32xf32>
    tpu.vector_store %arg7[%c0_2, %c17, %c0_3], %0 {strides = array<i32>} : memref<2x18x32xf32, #tpu.memory_space<vmem>>, vector<2x1x32xf32>,
    %c0_4 = arith.constant 0 : index
    %c0_5 = arith.constant 0 : index
    %c0_6 = arith.constant 0 : index
    %3 = vector.load %arg1[%c0_4, %c0_5, %c0_6] : memref<2x16x32xf32, #tpu.memory_space<vmem>>, vector<2x16x32xf32>
    %c0_7 = arith.constant 0 : index
    %c1 = arith.constant 1 : index
    %c0_8 = arith.constant 0 : index
    %4 = vector.load %arg7[%c0_7, %c1, %c0_8] : memref<2x18x32xf32, #tpu.memory_space<vmem>>, vector<2x16x32xf32>
    tpu.vector_store %arg7[%c0_7, %c1, %c0_8], %3 {strides = array<i32>} : memref<2x18x32xf32, #tpu.memory_space<vmem>>, vector<2x16x32xf32>,
    %c0_9 = arith.constant 0 : index
    %c0_10 = arith.constant 0 : index
    %5 = vector.load %arg2[%c0_9, %c0_10] : memref<3x32xf32, #tpu.memory_space<vmem>>, vector<3x32xf32>
    %c0_11 = arith.constant 0 : index
    %c0_12 = arith.constant 0 : index
    %6 = vector.load %arg3[%c0_11, %c0_12] : memref<1x32xf32, #tpu.memory_space<vmem>>, vector<1x32xf32>
    %7 = vector.shape_cast %6 : vector<1x32xf32> to vector<1x1x32xf32>
    %8 = vector.broadcast %7 : vector<1x1x32xf32> to vector<2x8x32xf32>
    %c0_13 = arith.constant 0 : index
    %c0_14 = arith.constant 0 : index
    %c0_15 = arith.constant 0 : index
    %9 = tpu.strided_load %arg7[%c0_13, %c0_14, %c0_15] {strides = array<i32: 1, 2, 1>} : memref<2x18x32xf32, #tpu.memory_space<vmem>>, vector<2x8x32xf32>
    %10 = vector.extract_strided_slice %5 {offsets = [0, 0], sizes = [1, 32], strides = [1, 1]} : vector<3x32xf32> to vector<1x32xf32>
    %11 = vector.shape_cast %10 : vector<1x32xf32> to vector<1x1x32xf32>
    %12 = vector.broadcast %11 : vector<1x1x32xf32> to vector<2x8x32xf32>
    %13 = arith.mulf %9, %12 : vector<2x8x32xf32>
    %14 = arith.addf %8, %13 : vector<2x8x32xf32>
    %c0_16 = arith.constant 0 : index
    %c1_17 = arith.constant 1 : index
    %c0_18 = arith.constant 0 : index
    %15 = tpu.strided_load %arg7[%c0_16, %c1_17, %c0_18] {strides = array<i32: 1, 2, 1>} : memref<2x18x32xf32, #tpu.memory_space<vmem>>, vector<2x8x32xf32>
    %16 = vector.extract_strided_slice %5 {offsets = [1, 0], sizes = [1, 32], strides = [1, 1]} : vector<3x32xf32> to vector<1x32xf32>
    %17 = vector.shape_cast %16 : vector<1x32xf32> to vector<1x1x32xf32>
    %18 = vector.broadcast %17 : vector<1x1x32xf32> to vector<2x8x32xf32>
    %19 = arith.mulf %15, %18 : vector<2x8x32xf32>
    %20 = arith.addf %14, %19 : vector<2x8x32xf32>
    %c0_19 = arith.constant 0 : index
    %c2 = arith.constant 2 : index
    %c0_20 = arith.constant 0 : index
    %21 = tpu.strided_load %arg7[%c0_19, %c2, %c0_20] {strides = array<i32: 1, 2, 1>} : memref<2x18x32xf32, #tpu.memory_space<vmem>>, vector<2x8x32xf32>
    %22 = vector.extract_strided_slice %5 {offsets = [2, 0], sizes = [1, 32], strides = [1, 1]} : vector<3x32xf32> to vector<1x32xf32>
    %23 = vector.shape_cast %22 : vector<1x32xf32> to vector<1x1x32xf32>
    %24 = vector.broadcast %23 : vector<1x1x32xf32> to vector<2x8x32xf32>
    %25 = arith.mulf %21, %24 : vector<2x8x32xf32>
    %26 = arith.addf %20, %25 : vector<2x8x32xf32>
    %cst_21 = arith.constant dense<0.000000e+00> : vector<2x8xf32>
    %27 = vector.multi_reduction <add>, %26, %cst_21 [2] : vector<2x8x32xf32> to vector<2x8xf32>
    %28 = vector.shape_cast %27 : vector<2x8xf32> to vector<2x8x1xf32>
    %cst_22 = arith.constant 3.200000e+01 : f32
    %29 = vector.broadcast %cst_22 : f32 to vector<2x8x1xf32>
    %30 = arith.divf %28, %29 : vector<2x8x1xf32>
    %31 = vector.broadcast %30 : vector<2x8x1xf32> to vector<2x8x32xf32>
    %32 = arith.subf %26, %31 : vector<2x8x32xf32>
    %33 = arith.mulf %32, %32 : vector<2x8x32xf32>
    %cst_23 = arith.constant dense<0.000000e+00> : vector<2x8xf32>
    %34 = vector.multi_reduction <add>, %33, %cst_23 [2] : vector<2x8x32xf32> to vector<2x8xf32>
    %35 = vector.shape_cast %34 : vector<2x8xf32> to vector<2x8x1xf32>
    %cst_24 = arith.constant 3.200000e+01 : f32
    %36 = vector.broadcast %cst_24 : f32 to vector<2x8x1xf32>
    %37 = arith.divf %35, %36 : vector<2x8x1xf32>
    %cst_25 = arith.constant 9.99999974E-6 : f32
    %38 = vector.broadcast %cst_25 : f32 to vector<2x8x1xf32>
    %39 = arith.addf %37, %38 : vector<2x8x1xf32>
    %40 = math.rsqrt %39 : vector<2x8x1xf32>
    %41 = vector.broadcast %40 : vector<2x8x1xf32> to vector<2x8x32xf32>
    %42 = arith.mulf %32, %41 : vector<2x8x32xf32>
    %c0_26 = arith.constant 0 : index
    %c0_27 = arith.constant 0 : index
    %43 = vector.load %arg4[%c0_26, %c0_27] : memref<1x32xf32, #tpu.memory_space<vmem>>, vector<1x32xf32>
    %44 = vector.shape_cast %43 : vector<1x32xf32> to vector<1x1x32xf32>
    %45 = vector.broadcast %44 : vector<1x1x32xf32> to vector<2x8x32xf32>
    %46 = arith.mulf %42, %45 : vector<2x8x32xf32>
    %c0_28 = arith.constant 0 : index
    %c0_29 = arith.constant 0 : index
    %47 = vector.load %arg5[%c0_28, %c0_29] : memref<1x32xf32, #tpu.memory_space<vmem>>, vector<1x32xf32>
    %48 = vector.shape_cast %47 : vector<1x32xf32> to vector<1x1x32xf32>
    %49 = vector.broadcast %48 : vector<1x1x32xf32> to vector<2x8x32xf32>
    %50 = arith.addf %46, %49 : vector<2x8x32xf32>
    %cst_30 = arith.constant 0.000000e+00 : f32
    %51 = vector.broadcast %cst_30 : f32 to vector<2x8x32xf32>
    %52 = arith.maximumf %50, %51 : vector<2x8x32xf32>
    %c0_31 = arith.constant 0 : index
    %c0_32 = arith.constant 0 : index
    %c0_33 = arith.constant 0 : index
    %53 = vector.load %arg8[%c0_31, %c0_32, %c0_33] : memref<2x8x32xf32, #tpu.memory_space<vmem>>, vector<2x8x32xf32>
    tpu.vector_store %arg8[%c0_31, %c0_32, %c0_33], %52 {strides = array<i32>} : memref<2x8x32xf32, #tpu.memory_space<vmem>>, vector<2x8x32xf32>,
    %c0_34 = arith.constant 0 : index
    %c0_35 = arith.constant 0 : index
    %c0_36 = arith.constant 0 : index
    %54 = tpu.strided_load %arg8[%c0_34, %c0_35, %c0_36] {strides = array<i32: 1, 2, 1>} : memref<2x8x32xf32, #tpu.memory_space<vmem>>, vector<2x4x32xf32>
    %c0_37 = arith.constant 0 : index
    %c1_38 = arith.constant 1 : index
    %c0_39 = arith.constant 0 : index
    %55 = tpu.strided_load %arg8[%c0_37, %c1_38, %c0_39] {strides = array<i32: 1, 2, 1>} : memref<2x8x32xf32, #tpu.memory_space<vmem>>, vector<2x4x32xf32>
    %56 = arith.maximumf %54, %55 : vector<2x4x32xf32>
    %c0_40 = arith.constant 0 : index
    %c0_41 = arith.constant 0 : index
    %c0_42 = arith.constant 0 : index
    %57 = vector.load %arg6[%c0_40, %c0_41, %c0_42] : memref<2x4x32xf32, #tpu.memory_space<vmem>>, vector<2x4x32xf32>
    tpu.vector_store %arg6[%c0_40, %c0_41, %c0_42], %56 {strides = array<i32>} : memref<2x4x32xf32, #tpu.memory_space<vmem>>, vector<2x4x32xf32>,
    return
  }
  func.func @transform_0(%arg0: i32) -> (i32, i32, i32) {
    %c0_i32 = arith.constant 0 : i32
    %c0_i32_0 = arith.constant 0 : i32
    %c0_i32_1 = arith.constant 0 : i32
    return %arg0, %c0_i32, %c0_i32_0 : i32, i32, i32
  }
  func.func @transform_1(%arg0: i32) -> (i32, i32) {
    %c0_i32 = arith.constant 0 : i32
    %c0_i32_0 = arith.constant 0 : i32
    %c0_i32_1 = arith.constant 0 : i32
    return %c0_i32, %c0_i32_0 : i32, i32
  }
  func.func @transform_2(%arg0: i32) -> (i32, i32) {
    %c0_i32 = arith.constant 0 : i32
    %c0_i32_0 = arith.constant 0 : i32
    %c0_i32_1 = arith.constant 0 : i32
    return %c0_i32, %c0_i32_0 : i32, i32
  }
  func.func @transform_3(%arg0: i32) -> (i32, i32) {
    %c0_i32 = arith.constant 0 : i32
    %c0_i32_0 = arith.constant 0 : i32
    %c0_i32_1 = arith.constant 0 : i32
    return %c0_i32, %c0_i32_0 : i32, i32
  }
  func.func @transform_4(%arg0: i32) -> (i32, i32) {
    %c0_i32 = arith.constant 0 : i32
    %c0_i32_0 = arith.constant 0 : i32
    %c0_i32_1 = arith.constant 0 : i32
    return %c0_i32, %c0_i32_0 : i32, i32
  }
  func.func @transform_5(%arg0: i32) -> (i32, i32, i32) {
    %c0_i32 = arith.constant 0 : i32
    %c0_i32_0 = arith.constant 0 : i32
    %c0_i32_1 = arith.constant 0 : i32
    return %arg0, %c0_i32, %c0_i32_0 : i32, i32, i32
  }
}

</mosaic_0001>

<bundles_post_ra>
// kernel: tpu_custom_call.1
= control target key start
LH: loop header
LB: loop body
LE: loop exit
PB: predicated region body
PF: predicated region fallthrough
CT: control target
= control target key end

     0   :  { %10 = vsyncpa [#allocation5], 0  ;;  %s363_s0 = inlined_call_operand.hbm [shape: f32[2,16,32], index: 0, kind: input, shape index: {}]   ;;  %s364_s1 = inlined_call_operand.hbm [shape: f32[3,32], index: 1, kind: input, shape index: {}]   ;;  %s365_s2 = inlined_call_operand.vmem [shape: f32[1,32], index: 2, kind: input, shape index: {}]   ;;  %s366_s3 = inlined_call_operand.vmem [shape: f32[1,32], index: 3, kind: input, shape index: {}]   ;;  %s367_s4 = inlined_call_operand.vmem [shape: f32[1,32], index: 4, kind: input, shape index: {}]   ;;  %s368_s5 = inlined_call_operand.hbm [shape: f32[2,4,32], index: 5, kind: output, shape index: {}]  }
   0x1   :  { %11 = vsyncpa [#allocation8], 0 }
   0x2   :  { %12 = vsyncpa [#allocation6], 0  ;;  %s270_s18 = smov [#allocation4]   ;;  %s198_s22 = scalar_lea.hbm %s363_s0, 512 }
   0x3   :  { %s18_s19 = sshll.u32 %s270_s18, 4  ;;  %p199_p0 = scmp.ne.s32.totalorder %s363_s0, %s198_s22  ;;  %s19_s19 = int_to_ptr.vmem [resolvable:$true] %s18_s19 }
   0x4   :  { %p202_p1 = scmp.lt.u32.totalorder %s198_s22, %s363_s0 }
   0x6   :  { %p204_p2 = pnand %p202_p1, %p199_p0 }
   0x8   :  { %207 = shalt.err (!%p204_p2)
}
   0x9   :  { %s208_s27 = scalar_lea.vmem %s19_s19, 512  ;;  %p213_p4 = scmp.lt.s32.totalorder %s19_s19, %s19_s19 }
   0xa   :  { %p209_p3 = scmp.ne.s32.totalorder %s19_s19, %s208_s27  ;;  %p214_p5 = scmp.lt.s32.totalorder %s208_s27, %s208_s27 }
   0xc   :  { %p215_p6 = por %p214_p5, %p213_p4 }
   0xe   :  { %p216_p7 = pnand %p215_p6, %p209_p3 }
  0x10   :  { %219 = shalt.err (!%p216_p7)
}
  0x11   :  { %s271_s28 = smov 128   ;;  %s272_s29 = smov 8  }
  0x12   :  { %24 = dma.hbm_to_vmem [thread:$0]  %s363_s0, 512, %s19_s19, [#allocation5], %s271_s28, %s271_s28, %s272_s29  }
  0x13   :  { %s273_s7 = smov [#allocation7]   ;;  %s220_s11 = scalar_lea.hbm %s364_s1, 64 }
  0x14   :  { %s31_s8 = sshll.u32 %s273_s7, 4  ;;  %p221_p8 = scmp.ne.s32.totalorder %s364_s1, %s220_s11  ;;  %s32_s8 = int_to_ptr.vmem [resolvable:$true] %s31_s8 }
  0x15   :  { %p224_p9 = scmp.lt.u32.totalorder %s220_s11, %s364_s1 }
  0x17   :  { %p226_p10 = pnand %p224_p9, %p221_p8 }
  0x19   :  { %229 = shalt.err (!%p226_p10)
}
  0x1a   :  { %s230_s16 = scalar_lea.vmem %s32_s8, 64  ;;  %p235_p12 = scmp.lt.s32.totalorder %s32_s8, %s32_s8 }
  0x1b   :  { %p231_p11 = scmp.ne.s32.totalorder %s32_s8, %s230_s16  ;;  %p236_p13 = scmp.lt.s32.totalorder %s230_s16, %s230_s16 }
  0x1d   :  { %p237_p0 = por %p236_p13, %p235_p12 }
  0x1f   :  { %p238_p1 = pnand %p237_p0, %p231_p11 }
  0x21   :  { %241 = shalt.err (!%p238_p1)
}
  0x22   :  { %34 = dma.hbm_to_vmem [thread:$0]  %s364_s1, 64, %s32_s8, [#allocation8]  }
  0x23   :  { %264 = dma.done.wait [#allocation5], 512  }
  0x24   :  { %265 = vsyncadd [#allocation5], 4294966784 }
  0x25   :  { %266 = dma.done.wait [#allocation8], 64  }
  0x26   :  { %267 = vsyncadd [#allocation8], 4294967232  ;;  %vm47_vm0 = vcmask 253952   ;;  %v72_v0 = vlaneseq  ;;  %v274_v1 = vmov 0.0   ;;  %vm56_vm1 = vcmask 261120   ;;  %v52_v3 = vld [vmem:[#allocation4] sm:$0xff] }
  0x27   :  { %48 = vst.msk [vmem:[#allocation2] sm:$0x1] %vm47_vm0, %v274_v1  ;;  %49 = vst.msk [vmem:[#allocation2 + $0x18] sm:$0x1] %vm47_vm0, %v274_v1  ;;  %v53_v4 = vld [vmem:[#allocation4 + $0x8] sm:$0xff]  ;;  %v54_v7 = vld [vmem:[#allocation4 + $0x10] sm:$0xff] }
  0x28   :  { %v73_v2 = vshrl.u32 %v72_v0, 7  ;;  %57 = vst.msk [vmem:[#allocation2 + $0x1] sm:$0xff] %vm56_vm1, %v52_v3  ;;  %58 = vst.msk [vmem:[#allocation2 + $0x9] sm:$0xff] %vm56_vm1, %v53_v4  ;;  %v55_v8 = vld [vmem:[#allocation4 + $0x18] sm:$0xff]  ;;  %v61_v9 = vld [vmem:[#allocation7] sm:$0x7] }
  0x29   :  { %59 = vst.msk [vmem:[#allocation2 + $0x19] sm:$0xff] %vm56_vm1, %v54_v7  ;;  %60 = vst.msk [vmem:[#allocation2 + $0x21] sm:$0xff] %vm56_vm1, %v55_v8  ;;  %v183_v13 = vld [vmem:[%s365_s2] ss:$0 sm:$0xff]  ;;  %vm162_vm2 = vcmask 257024  }
  0x2a   :  { %v74_v5 = vsub.s32 0, %v73_v2  ;;  %v86_v6 = vsub.s32 1, %v73_v2  ;;  %v98_v10 = vsub.s32 2, %v73_v2  ;;  %v184_v52 = vld [vmem:[%s366_s3] ss:$0 sm:$0xff]  ;;  %s275_s3 = smov [#allocation9]  }
  0x2b   :  { %v185_v54 = vld [vmem:[%s367_s4] ss:$0 sm:$0xff]  ;;  %s170_s22 = sshll.u32 %s275_s3, 4  ;;  %s171_s22 = int_to_ptr.vmem [resolvable:$true] %s170_s22 }
  0x2c   :  { %v75_v11 = vrot.slane %v61_v9, %v74_v5  ;;  %v87_v12 = vrot.slane %v61_v9, %v86_v6  ;;  %v99_v14 = vrot.slane %v61_v9, %v98_v10  ;;  %s242_s4 = scalar_lea.vmem %s171_s22, 128  ;;  %p247_p3 = scmp.lt.s32.totalorder %s171_s22, %s171_s22 }
  0x2d   :  { %p243_p2 = scmp.ne.s32.totalorder %s171_s22, %s242_s4  ;;  %p248_p4 = scmp.lt.s32.totalorder %s242_s4, %s242_s4 }
  0x2f   :  { %v69_v15 = vld [vmem:[#allocation2] ss:$2 sm:$0xff]  ;;  %v81_v16 = vld [vmem:[#allocation2 + $0x1] ss:$2 sm:$0xff]  ;;  %p249_p5 = por %p248_p4, %p247_p3 }
  0x30   :  { %v93_v17 = vld [vmem:[#allocation2 + $0x2] ss:$2 sm:$0xff]  ;;  %v76_v18 = vmul.f32 %v75_v11, %v69_v15  ;;  %v88_v19 = vmul.f32 %v87_v12, %v81_v16  ;;  %v83_v21 = vld [vmem:[#allocation2 + $0x19] ss:$2 sm:$0xff] }
  0x31   :  { %v71_v20 = vld [vmem:[#allocation2 + $0x18] ss:$2 sm:$0xff]  ;;  %v89_v24 = vmul.f32 %v87_v12, %v83_v21  ;;  %v100_v26 = vmul.f32 %v99_v14, %v93_v17  ;;  %p250_p6 = pnand %p249_p5, %p243_p2 }
  0x32   :  { %v95_v22 = vld [vmem:[#allocation2 + $0x1a] ss:$2 sm:$0xff]  ;;  %v77_v23 = vmul.f32 %v75_v11, %v71_v20  ;;  %v78_v25 = vadd.f32 %v183_v13, %v76_v18 }
  0x33   :  { %v101_v28 = vmul.f32 %v99_v14, %v95_v22 }
  0x34   :  { %v79_v27 = vadd.f32 %v183_v13, %v77_v23  ;;  %v90_v29 = vadd.f32 %v88_v19, %v78_v25 }
  0x36   :  { %v91_v30 = vadd.f32 %v89_v24, %v79_v27  ;;  %v102_v31 = vadd.f32 %v100_v26, %v90_v29 }
  0x38   :  { %v103_v32 = vadd.f32 %v101_v28, %v91_v30  ;;  %v104_v33 = vsel %vm56_vm1, %v102_v31, 0.0 }
  0x39   :  { %105 = vadd.xlane.f32.xlu0 %v104_v33 }
  0x3a   :  { %v107_v34 = vsel %vm56_vm1, %v103_v32, 0.0 }
  0x3d   :  { %108 = vadd.xlane.f32.xlu0 %v107_v34 }
  0xc6   :  { %v106_v35 = vpop.xlane.xlu0 %105 }
  0xc7   :  { %v111_v36 = vmul.f32 0.03125, %v106_v35 }
  0xc9   :  { %v113_v37 = vsub.f32 %v102_v31, %v111_v36 }
  0xca   :  { %v109_v38 = vpop.xlane.xlu0 %108 }
  0xcb   :  { %v112_v39 = vmul.f32 0.03125, %v109_v38  ;;  %v115_v40 = vmul.f32 %v113_v37, %v113_v37 }
  0xcd   :  { %v114_v41 = vsub.f32 %v103_v32, %v112_v39  ;;  %v117_v42 = vsel %vm56_vm1, %v115_v40, 0.0 }
  0xce   :  { %118 = vadd.xlane.f32.xlu1 %v117_v42 }
  0xcf   :  { %v116_v43 = vmul.f32 %v114_v41, %v114_v41 }
  0xd1   :  { %v120_v44 = vsel %vm56_vm1, %v116_v43, 0.0 }
  0xd2   :  { %121 = vadd.xlane.f32.xlu1 %v120_v44 }
 0x15b   :  { %v119_v45 = vpop.xlane.xlu1 %118 }
 0x15c   :  { %v123_v46 = vmul.f32 0.03125, %v119_v45 }
 0x15e   :  { %v125_v47 = vadd.f32 1e-05, %v123_v46 }
 0x15f   :  { %v122_v48 = vpop.xlane.xlu1 %121 }
 0x160   :  { %194 = vrsqrt.f32 %v125_v47  ;;  %v124_v49 = vmul.f32 0.03125, %v122_v48 }
 0x162   :  { %v126_v50 = vadd.f32 1e-05, %v124_v49 }
 0x164   :  { %196 = vrsqrt.f32 %v126_v50 }
 0x16a   :  { %v195_v51 = vpop.eup %194 }
 0x16b   :  { %v129_v53 = vmul.f32 %v195_v51, %v113_v37 }
 0x16d   :  { %v138_v55 = vmul.f32 %v184_v52, %v129_v53 }
 0x16e   :  { %v197_v56 = vpop.eup %196 }
 0x16f   :  { %v147_v57 = vadd.f32 %v185_v54, %v138_v55  ;;  %v130_v58 = vmul.f32 %v197_v56, %v114_v41 }
 0x171   :  { %v149_v59 = vmax.f32 %v147_v57, 0.0  ;;  %v139_v60 = vmul.f32 %v184_v52, %v130_v58 }
 0x173   :  { %151 = vst.msk [vmem:[#allocation3] sm:$0xff] %vm56_vm1, %v149_v59  ;;  %v148_v61 = vadd.f32 %v185_v54, %v139_v60 }
 0x175   :  { %v150_v62 = vmax.f32 %v148_v61, 0.0 }
 0x177   :  { %152 = vst.msk [vmem:[#allocation3 + $0x8] sm:$0xff] %vm56_vm1, %v150_v62 }
 0x17a   :  { %v153_v63 = vld [vmem:[#allocation3] ss:$2 sm:$0xf]  ;;  %v157_v0 = vld [vmem:[#allocation3 + $0x1] ss:$2 sm:$0xf] }
 0x17b   :  { %v160_v1 = vmax.f32 %v153_v63, %v157_v0 }
 0x17d   :  { %163 = vst.msk [vmem:[#allocation9] sm:$0xf] %vm162_vm2, %v160_v1 }
 0x17e   :  { %v155_v2 = vld [vmem:[#allocation3 + $0x8] ss:$2 sm:$0xf]  ;;  %v159_v3 = vld [vmem:[#allocation3 + $0x9] ss:$2 sm:$0xf] }
 0x17f   :  { %v161_v4 = vmax.f32 %v155_v2, %v159_v3 }
 0x181   :  { %164 = vst.msk [vmem:[#allocation9 + $0x4] sm:$0xf] %vm162_vm2, %v161_v4 }
 0x182   :  { %253 = shalt.err (!%p250_p6)
}
 0x183   :  { %s254_s25 = scalar_lea.hbm %s368_s5, 128 }
 0x184   :  { %p255_p7 = scmp.ne.s32.totalorder %s368_s5, %s254_s25  ;;  %p258_p8 = scmp.lt.u32.totalorder %s254_s25, %s368_s5 }
 0x186   :  { %p260_p9 = pnand %p258_p8, %p255_p7 }
 0x188   :  { %263 = shalt.err (!%p260_p9)
}
 0x189   :  { %s276_s30 = smov 64   ;;  %s277_s6 = smov 4  }
 0x18a   :  { %176 = dma.vmem_to_hbm [thread:$0]  %s171_s22, 128, %s368_s5, [#allocation6], %s276_s30, %s276_s30, %s277_s6  }
 0x18b   :  { %268 = dma.done.wait [#allocation6], 128  }
 0x18c   :  { %269 = vsyncadd [#allocation6], 4294967168 }
 0x18d   :  { %180 = vsyncpa [#allocation5], 1 }
 0x18e   :  { %181 = vsyncpa [#allocation8], 1 }
 0x18f   :  { %182 = vsyncpa [#allocation6], 1 }

</bundles_post_ra>
